<compile_context>
chip_gen: v6e
topology: v6e:2x2x1
jax: 0.10.0
libtpu: 0.0.40
codegen_flags: <defaults>
</compile_context>

<pallas_src>
import functools

import jax
import jax.numpy as jnp
from jax import lax
from jax.experimental import pallas as pl
from jax.experimental.pallas import tpu as pltpu

HEAD_LANES = 128  # lane-dense fused mel|stop output width


# ---------------------------------------------------------------------------
# Pallas kernel (whole per-batch decoder, fused)
# ---------------------------------------------------------------------------
def _softmax(s):
    m = jnp.max(s, axis=-1, keepdims=True)
    e = jnp.exp(s - m)
    return e * pl.reciprocal(jnp.sum(e, axis=-1, keepdims=True), approx=True)


def _bf16(x):
    return x.astype(jnp.bfloat16)


def fused_decoder_kernel(leave_one,
                         in_len_ref, tgt_len_ref,          # scalar prefetch (SMEM)
                         tgt_ref, enc_ref,                 # per-batch activations
                         pw0_ref, pb0_ref, pw1_ref, pb1_ref, pwf_ref,
                         wq_ref, wk_ref, wv_ref, wo_ref,
                         cq_ref, ck_ref, cv_ref, co_ref,
                         wf1_ref, bf1_ref, wf2_ref, bf2_ref,
                         whead_ref, bhead_ref,
                         head_ref, align_ref):
    b = pl.program_id(0)
    in_len = in_len_ref[b]
    tgt_len = tgt_len_ref[b]

    # --- prenet: dense0 -> relu -> dense1 -> relu -> dense_final (no bias) ---
    t = tgt_ref[...]                                           # (Td, M) f32
    h = jnp.dot(_bf16(t), pw0_ref[...],
                preferred_element_type=jnp.float32) + pb0_ref[...]
    h = jnp.maximum(h, 0.0)                                    # dropout = identity (eval)
    h = jnp.dot(_bf16(h), pw1_ref[...],
                preferred_element_type=jnp.float32) + pb1_ref[...]
    h = jnp.maximum(h, 0.0)
    x = jnp.dot(_bf16(h), pwf_ref[...],
                preferred_element_type=jnp.float32)            # (Td, D)

    Td, D = x.shape
    Te = enc_ref.shape[0]

    if leave_one:                                              # dec_inputs[:, -1] *= 0
        rows = lax.broadcasted_iota(jnp.int32, (Td, 1), 0)
        x = jnp.where(rows < Td - 1, x, 0.0)

    scale = 1.0 / jnp.sqrt(jnp.float32(D))
    xb = _bf16(x)

    # --- causal, length-masked self-attention ---
    q = jnp.dot(xb, wq_ref[...], preferred_element_type=jnp.float32)
    k = jnp.dot(xb, wk_ref[...], preferred_element_type=jnp.float32)
    v = jnp.dot(xb, wv_ref[...], preferred_element_type=jnp.float32)
    # contract on (1, 1): no explicit transpose materialized
    s = lax.dot_general(_bf16(q), _bf16(k), (((1,), (1,)), ((), ())),
                        preferred_element_type=jnp.float32) * scale       # (Td, Td)
    row = lax.broadcasted_iota(jnp.int32, (Td, Td), 0)
    col = lax.broadcasted_iota(jnp.int32, (Td, Td), 1)
    s = jnp.where((col <= row) & (col < tgt_len), s, -1e9)
    p = _softmax(s)
    sa = jnp.dot(_bf16(jnp.dot(_bf16(p), _bf16(v),
                               preferred_element_type=jnp.float32)),
                 wo_ref[...], preferred_element_type=jnp.float32)
    h1 = x + sa

    # --- encoder-length-masked cross-attention (align = attention weights) ---
    encb = _bf16(enc_ref[...])                                 # (Te, E)
    q2 = jnp.dot(_bf16(h1), cq_ref[...], preferred_element_type=jnp.float32)
    k2 = jnp.dot(encb, ck_ref[...], preferred_element_type=jnp.float32)
    v2 = jnp.dot(encb, cv_ref[...], preferred_element_type=jnp.float32)
    s2 = lax.dot_general(_bf16(q2), _bf16(k2), (((1,), (1,)), ((), ())),
                         preferred_element_type=jnp.float32) * scale      # (Td, Te)
    col2 = lax.broadcasted_iota(jnp.int32, (Td, Te), 1)
    s2 = jnp.where(col2 < in_len, s2, -1e9)
    p2 = _softmax(s2)
    ca = jnp.dot(_bf16(jnp.dot(_bf16(p2), _bf16(v2),
                               preferred_element_type=jnp.float32)),
                 co_ref[...], preferred_element_type=jnp.float32)
    h2 = h1 + ca

    # --- position-wise feed forward ---
    f = jnp.dot(_bf16(h2), wf1_ref[...],
                preferred_element_type=jnp.float32) + bf1_ref[...]
    f = jnp.maximum(f, 0.0)
    f = jnp.dot(_bf16(f), wf2_ref[...],
                preferred_element_type=jnp.float32) + bf2_ref[...]
    out = h2 + f                                               # (Td, D)

    # --- fused lane-dense heads (mel | stop | zero-pad) + impute masking ---
    slab = jnp.dot(_bf16(out), whead_ref[...],
                   preferred_element_type=jnp.float32) + bhead_ref[...]   # (Td, 128)
    rmask = lax.broadcasted_iota(jnp.int32, slab.shape, 0) < tgt_len
    head_ref[...] = jnp.where(rmask, slab, 0.0)
    align_ref[...] = p2


# ---------------------------------------------------------------------------
# Wrapper
# ---------------------------------------------------------------------------
@functools.partial(jax.jit, static_argnames=("leave_one",))
def decoder_forward(encoder_outputs, input_lengths, targets, target_lengths,
                    params, leave_one=False):
    B, Td, M = targets.shape
    Te, E = encoder_outputs.shape[1], encoder_outputs.shape[2]
    D = params["prenet_wf"].shape[1]

    bf16 = jnp.bfloat16
    # Fused lane-dense head weight: [mel_w | stop_w | 0-pad] -> (D, 128).
    # Padding/concat done once here in the wrapper, not per grid step.
    w_head = jnp.zeros((D, HEAD_LANES), bf16)
    w_head = w_head.at[:, :M].set(params["mel_w"].astype(bf16))
    w_head = w_head.at[:, M:M + 1].set(params["stop_w"].astype(bf16))
    b_head = jnp.zeros((1, HEAD_LANES), jnp.float32)          # mel_net has no bias
    b_head = b_head.at[:, M:M + 1].set(params["stop_b"])

    weight_ops = [
        params["prenet_w0"].astype(bf16), params["prenet_b0"],
        params["prenet_w1"].astype(bf16), params["prenet_b1"],
        params["prenet_wf"].astype(bf16),
        params["sa_wq"].astype(bf16), params["sa_wk"].astype(bf16),
        params["sa_wv"].astype(bf16), params["sa_wo"].astype(bf16),
        params["ca_wq"].astype(bf16), params["ca_wk"].astype(bf16),
        params["ca_wv"].astype(bf16), params["ca_wo"].astype(bf16),
        params["ffn_w1"].astype(bf16), params["ffn_b1"],
        params["ffn_w2"].astype(bf16), params["ffn_b2"],
        w_head, b_head,
    ]
    # Weights: whole-array VMEM residence, no per-step double-buffering.
    vmem_spec = pl.BlockSpec(memory_space=pltpu.MemorySpace.VMEM)

    grid_spec = pltpu.PrefetchScalarGridSpec(
        num_scalar_prefetch=2,
        grid=(B,),
        in_specs=[
            pl.BlockSpec((pl.Squeezed(), Td, M), lambda b, il, tl: (b, 0, 0)),   # targets
            pl.BlockSpec((pl.Squeezed(), Te, E), lambda b, il, tl: (b, 0, 0)),   # encoder
        ] + [vmem_spec] * len(weight_ops),
        out_specs=[
            pl.BlockSpec((pl.Squeezed(), Td, HEAD_LANES), lambda b, il, tl: (b, 0, 0)),
            pl.BlockSpec((pl.Squeezed(), Td, Te), lambda b, il, tl: (b, 0, 0)),
        ],
    )

    head_slab, align = pl.pallas_call(
        functools.partial(fused_decoder_kernel, leave_one),
        grid_spec=grid_spec,
        out_shape=(jax.ShapeDtypeStruct((B, Td, HEAD_LANES), jnp.float32),
                   jax.ShapeDtypeStruct((B, Td, Te), jnp.float32)),
        compiler_params=pltpu.CompilerParams(
            dimension_semantics=("parallel",)),   # batch iterations independent
    )(input_lengths, target_lengths, targets, encoder_outputs, *weight_ops)

    mels = head_slab[..., :M]
    stop_logits = head_slab[..., M]
    return mels, stop_logits, align


# ---------------------------------------------------------------------------
# Deterministic parameter init (PyTorch Linear weights stored transposed [in, out])
# ---------------------------------------------------------------------------
def init_params(key, num_mels, prenet_hidden, decoder_hidden, encoder_hidden, ffn_hidden):
    ks = jax.random.split(key, 20)
    n = iter(range(20))
    w = lambda shape: (jax.random.normal(ks[next(n)], shape, jnp.float32) * 0.05)
    M, P, D, E, F = num_mels, prenet_hidden, decoder_hidden, encoder_hidden, ffn_hidden
    return {
        # prenet
        "prenet_w0": w((M, P)), "prenet_b0": w((1, P)),
        "prenet_w1": w((P, P)), "prenet_b1": w((1, P)),
        "prenet_wf": w((P, D)),                       # dense_final: bias=False
        # transformer decoder layer
        "sa_wq": w((D, D)), "sa_wk": w((D, D)), "sa_wv": w((D, D)), "sa_wo": w((D, D)),
        "ca_wq": w((D, D)), "ca_wk": w((E, D)), "ca_wv": w((E, D)), "ca_wo": w((D, D)),
        "ffn_w1": w((D, F)), "ffn_b1": w((1, F)),
        "ffn_w2": w((F, D)), "ffn_b2": w((1, D)),
        # output heads
        "mel_w": w((D, M)),                           # mel_net: bias=False
        "stop_w": w((D, 1)), "stop_b": w((1, 1)),
    }


if __name__ == "__main__":
    B, Td, Te = 2, 8, 16
    num_mels, prenet_hidden, decoder_hidden, encoder_hidden, ffn_hidden = 8, 32, 32, 32, 64

    key = jax.random.PRNGKey(0)
    kp, ke, kt = jax.random.split(key, 3)
    params = init_params(kp, num_mels, prenet_hidden, decoder_hidden,
                         encoder_hidden, ffn_hidden)

    encoder_outputs = jax.random.normal(ke, (B, Te, encoder_hidden), jnp.float32)
    targets = jax.random.normal(kt, (B, Td, num_mels), jnp.float32)
    input_lengths = jnp.array([16, 12], dtype=jnp.int32)
    target_lengths = jnp.array([8, 6], dtype=jnp.int32)

    mels, stop_logits, align = decoder_forward(
        encoder_outputs, input_lengths, targets, target_lengths, params, leave_one=False)
    jax.block_until_ready((mels, stop_logits, align))

    assert mels.shape == (B, Td, num_mels)
    assert stop_logits.shape == (B, Td)
    assert align.shape == (B, Td, Te)
    assert bool(jnp.all(jnp.isfinite(mels)))
    print("KERNEL_OK")
</pallas_src>

<mosaic_0001>
module attributes {stable_mosaic.version = 11 : i64} {
  func.func @fused_decoder_kernel(%arg0: i32, %arg1: memref<2xi32, #tpu.memory_space<smem>>, %arg2: memref<2xi32, #tpu.memory_space<smem>>, %arg3: memref<1x8x8xf32, #tpu.memory_space<vmem>>, %arg4: memref<1x16x32xf32, #tpu.memory_space<vmem>>, %arg5: memref<8x32xbf16, #tpu.memory_space<vmem>>, %arg6: memref<1x32xf32, #tpu.memory_space<vmem>>, %arg7: memref<32x32xbf16, #tpu.memory_space<vmem>>, %arg8: memref<1x32xf32, #tpu.memory_space<vmem>>, %arg9: memref<32x32xbf16, #tpu.memory_space<vmem>>, %arg10: memref<32x32xbf16, #tpu.memory_space<vmem>>, %arg11: memref<32x32xbf16, #tpu.memory_space<vmem>>, %arg12: memref<32x32xbf16, #tpu.memory_space<vmem>>, %arg13: memref<32x32xbf16, #tpu.memory_space<vmem>>, %arg14: memref<32x32xbf16, #tpu.memory_space<vmem>>, %arg15: memref<32x32xbf16, #tpu.memory_space<vmem>>, %arg16: memref<32x32xbf16, #tpu.memory_space<vmem>>, %arg17: memref<32x32xbf16, #tpu.memory_space<vmem>>, %arg18: memref<32x64xbf16, #tpu.memory_space<vmem>>, %arg19: memref<1x64xf32, #tpu.memory_space<vmem>>, %arg20: memref<64x32xbf16, #tpu.memory_space<vmem>>, %arg21: memref<1x32xf32, #tpu.memory_space<vmem>>, %arg22: memref<32x128xbf16, #tpu.memory_space<vmem>>, %arg23: memref<1x128xf32, #tpu.memory_space<vmem>>, %arg24: memref<1x8x128xf32, #tpu.memory_space<vmem>>, %arg25: memref<1x8x16xf32, #tpu.memory_space<vmem>>) attributes {dimension_semantics = [#tpu.dimension_semantics<parallel>], iteration_bounds = array<i64: 2>, scalar_prefetch = 2 : i64, scratch_operands = 0 : i64, tpu.core_type = #tpu.core_type<tc>, window_params = [{transform_indices = @transform_0, window_bounds = array<i64: 1, 8, 8>}, {transform_indices = @transform_1, window_bounds = array<i64: 1, 16, 32>}, {pipeline_mode = #tpu.pipeline_mode<synchronous>, transform_indices = @transform_2, window_bounds = array<i64: 8, 32>}, {pipeline_mode = #tpu.pipeline_mode<synchronous>, transform_indices = @transform_3, window_bounds = array<i64: 1, 32>}, {pipeline_mode = #tpu.pipeline_mode<synchronous>, transform_indices = @transform_4, window_bounds = array<i64: 32, 32>}, {pipeline_mode = #tpu.pipeline_mode<synchronous>, transform_indices = @transform_5, window_bounds = array<i64: 1, 32>}, {pipeline_mode = #tpu.pipeline_mode<synchronous>, transform_indices = @transform_6, window_bounds = array<i64: 32, 32>}, {pipeline_mode = #tpu.pipeline_mode<synchronous>, transform_indices = @transform_7, window_bounds = array<i64: 32, 32>}, {pipeline_mode = #tpu.pipeline_mode<synchronous>, transform_indices = @transform_8, window_bounds = array<i64: 32, 32>}, {pipeline_mode = #tpu.pipeline_mode<synchronous>, transform_indices = @transform_9, window_bounds = array<i64: 32, 32>}, {pipeline_mode = #tpu.pipeline_mode<synchronous>, transform_indices = @transform_10, window_bounds = array<i64: 32, 32>}, {pipeline_mode = #tpu.pipeline_mode<synchronous>, transform_indices = @transform_11, window_bounds = array<i64: 32, 32>}, {pipeline_mode = #tpu.pipeline_mode<synchronous>, transform_indices = @transform_12, window_bounds = array<i64: 32, 32>}, {pipeline_mode = #tpu.pipeline_mode<synchronous>, transform_indices = @transform_13, window_bounds = array<i64: 32, 32>}, {pipeline_mode = #tpu.pipeline_mode<synchronous>, transform_indices = @transform_14, window_bounds = array<i64: 32, 32>}, {pipeline_mode = #tpu.pipeline_mode<synchronous>, transform_indices = @transform_15, window_bounds = array<i64: 32, 64>}, {pipeline_mode = #tpu.pipeline_mode<synchronous>, transform_indices = @transform_16, window_bounds = array<i64: 1, 64>}, {pipeline_mode = #tpu.pipeline_mode<synchronous>, transform_indices = @transform_17, window_bounds = array<i64: 64, 32>}, {pipeline_mode = #tpu.pipeline_mode<synchronous>, transform_indices = @transform_18, window_bounds = array<i64: 1, 32>}, {pipeline_mode = #tpu.pipeline_mode<synchronous>, transform_indices = @transform_19, window_bounds = array<i64: 32, 128>}, {pipeline_mode = #tpu.pipeline_mode<synchronous>, transform_indices = @transform_20, window_bounds = array<i64: 1, 128>}, {transform_indices = @transform_21, window_bounds = array<i64: 1, 8, 128>}, {transform_indices = @transform_22, window_bounds = array<i64: 1, 8, 16>}]} {
    %0 = arith.index_cast %arg0 : i32 to index
    %1 = memref.load %arg1[%0] : memref<2xi32, #tpu.memory_space<smem>>
    %2 = arith.index_cast %arg0 : i32 to index
    %3 = memref.load %arg2[%2] : memref<2xi32, #tpu.memory_space<smem>>
    %c0 = arith.constant 0 : index
    %c0_0 = arith.constant 0 : index
    %c0_1 = arith.constant 0 : index
    %4 = vector.load %arg3[%c0, %c0_0, %c0_1] : memref<1x8x8xf32, #tpu.memory_space<vmem>>, vector<1x8x8xf32>
    %5 = vector.shape_cast %4 : vector<1x8x8xf32> to vector<8x8xf32>
    %6 = arith.truncf %5 : vector<8x8xf32> to vector<8x8xbf16>
    %c0_2 = arith.constant 0 : index
    %c0_3 = arith.constant 0 : index
    %7 = vector.load %arg5[%c0_2, %c0_3] : memref<8x32xbf16, #tpu.memory_space<vmem>>, vector<8x32xbf16>
    %cst = arith.constant dense<0.000000e+00> : vector<8x32xf32>
    %8 = tpu.matmul %6, %7, %cst {dimension_numbers = #tpu.dot_dimension_numbers<[1], [0], [0], [1], [0, 0, 1, 1], [], []>} : vector<8x8xbf16>, vector<8x32xbf16>, vector<8x32xf32> -> vector<8x32xf32>
    %c0_4 = arith.constant 0 : index
    %c0_5 = arith.constant 0 : index
    %9 = vector.load %arg6[%c0_4, %c0_5] : memref<1x32xf32, #tpu.memory_space<vmem>>, vector<1x32xf32>
    %10 = vector.broadcast %9 : vector<1x32xf32> to vector<8x32xf32>
    %11 = arith.addf %8, %10 : vector<8x32xf32>
    %cst_6 = arith.constant 0.000000e+00 : f32
    %12 = vector.broadcast %cst_6 : f32 to vector<8x32xf32>
    %13 = arith.maximumf %11, %12 : vector<8x32xf32>
    %14 = arith.truncf %13 : vector<8x32xf32> to vector<8x32xbf16>
    %c0_7 = arith.constant 0 : index
    %c0_8 = arith.constant 0 : index
    %15 = vector.load %arg7[%c0_7, %c0_8] : memref<32x32xbf16, #tpu.memory_space<vmem>>, vector<32x32xbf16>
    %cst_9 = arith.constant dense<0.000000e+00> : vector<8x32xf32>
    %16 = tpu.matmul %14, %15, %cst_9 {dimension_numbers = #tpu.dot_dimension_numbers<[1], [0], [0], [1], [0, 0, 1, 1], [], []>} : vector<8x32xbf16>, vector<32x32xbf16>, vector<8x32xf32> -> vector<8x32xf32>
    %c0_10 = arith.constant 0 : index
    %c0_11 = arith.constant 0 : index
    %17 = vector.load %arg8[%c0_10, %c0_11] : memref<1x32xf32, #tpu.memory_space<vmem>>, vector<1x32xf32>
    %18 = vector.broadcast %17 : vector<1x32xf32> to vector<8x32xf32>
    %19 = arith.addf %16, %18 : vector<8x32xf32>
    %cst_12 = arith.constant 0.000000e+00 : f32
    %20 = vector.broadcast %cst_12 : f32 to vector<8x32xf32>
    %21 = arith.maximumf %19, %20 : vector<8x32xf32>
    %22 = arith.truncf %21 : vector<8x32xf32> to vector<8x32xbf16>
    %c0_13 = arith.constant 0 : index
    %c0_14 = arith.constant 0 : index
    %23 = vector.load %arg9[%c0_13, %c0_14] : memref<32x32xbf16, #tpu.memory_space<vmem>>, vector<32x32xbf16>
    %cst_15 = arith.constant dense<0.000000e+00> : vector<8x32xf32>
    %24 = tpu.matmul %22, %23, %cst_15 {dimension_numbers = #tpu.dot_dimension_numbers<[1], [0], [0], [1], [0, 0, 1, 1], [], []>} : vector<8x32xbf16>, vector<32x32xbf16>, vector<8x32xf32> -> vector<8x32xf32>
    %cst_16 = arith.constant 3.200000e+01 : f32
    %25 = math.sqrt %cst_16 : f32
    %cst_17 = arith.constant 1.000000e+00 : f32
    %26 = arith.divf %cst_17, %25 : f32
    %27 = arith.truncf %24 : vector<8x32xf32> to vector<8x32xbf16>
    %c0_18 = arith.constant 0 : index
    %c0_19 = arith.constant 0 : index
    %28 = vector.load %arg10[%c0_18, %c0_19] : memref<32x32xbf16, #tpu.memory_space<vmem>>, vector<32x32xbf16>
    %cst_20 = arith.constant dense<0.000000e+00> : vector<8x32xf32>
    %29 = tpu.matmul %27, %28, %cst_20 {dimension_numbers = #tpu.dot_dimension_numbers<[1], [0], [0], [1], [0, 0, 1, 1], [], []>} : vector<8x32xbf16>, vector<32x32xbf16>, vector<8x32xf32> -> vector<8x32xf32>
    %c0_21 = arith.constant 0 : index
    %c0_22 = arith.constant 0 : index
    %30 = vector.load %arg11[%c0_21, %c0_22] : memref<32x32xbf16, #tpu.memory_space<vmem>>, vector<32x32xbf16>
    %cst_23 = arith.constant dense<0.000000e+00> : vector<8x32xf32>
    %31 = tpu.matmul %27, %30, %cst_23 {dimension_numbers = #tpu.dot_dimension_numbers<[1], [0], [0], [1], [0, 0, 1, 1], [], []>} : vector<8x32xbf16>, vector<32x32xbf16>, vector<8x32xf32> -> vector<8x32xf32>
    %c0_24 = arith.constant 0 : index
    %c0_25 = arith.constant 0 : index
    %32 = vector.load %arg12[%c0_24, %c0_25] : memref<32x32xbf16, #tpu.memory_space<vmem>>, vector<32x32xbf16>
    %cst_26 = arith.constant dense<0.000000e+00> : vector<8x32xf32>
    %33 = tpu.matmul %27, %32, %cst_26 {dimension_numbers = #tpu.dot_dimension_numbers<[1], [0], [0], [1], [0, 0, 1, 1], [], []>} : vector<8x32xbf16>, vector<32x32xbf16>, vector<8x32xf32> -> vector<8x32xf32>
    %34 = arith.truncf %29 : vector<8x32xf32> to vector<8x32xbf16>
    %35 = arith.truncf %31 : vector<8x32xf32> to vector<8x32xbf16>
    %cst_27 = arith.constant dense<0.000000e+00> : vector<8x8xf32>
    %36 = tpu.matmul %34, %35, %cst_27 {dimension_numbers = #tpu.dot_dimension_numbers<[1], [1], [0], [0], [0, 0, 1, 0], [], []>} : vector<8x32xbf16>, vector<8x32xbf16>, vector<8x8xf32> -> vector<8x8xf32>
    %37 = vector.broadcast %26 : f32 to vector<8x8xf32>
    %38 = arith.mulf %36, %37 : vector<8x8xf32>
    %39 = tpu.iota {dimensions = array<i32: 0>} : vector<8x8xi32>
    %40 = tpu.iota {dimensions = array<i32: 1>} : vector<8x8xi32>
    %41 = arith.cmpi sle, %40, %39 : vector<8x8xi32>
    %42 = vector.broadcast %3 : i32 to vector<8x8xi32>
    %43 = arith.cmpi slt, %40, %42 : vector<8x8xi32>
    %44 = arith.andi %41, %43 : vector<8x8xi1>
    %cst_28 = arith.constant -1.000000e+09 : f32
    %45 = vector.broadcast %cst_28 : f32 to vector<8x8xf32>
    %46 = arith.select %44, %38, %45 : vector<8x8xi1>, vector<8x8xf32>
    %cst_29 = arith.constant dense<0xFF800000> : vector<8xf32>
    %47 = vector.multi_reduction <maximumf>, %46, %cst_29 [1] : vector<8x8xf32> to vector<8xf32>
    %48 = vector.shape_cast %47 : vector<8xf32> to vector<8x1xf32>
    %49 = vector.broadcast %48 : vector<8x1xf32> to vector<8x8xf32>
    %50 = arith.subf %46, %49 : vector<8x8xf32>
    %51 = math.exp %50 : vector<8x8xf32>
    %cst_30 = arith.constant dense<0.000000e+00> : vector<8xf32>
    %52 = vector.multi_reduction <add>, %51, %cst_30 [1] : vector<8x8xf32> to vector<8xf32>
    %53 = vector.shape_cast %52 : vector<8xf32> to vector<8x1xf32>
    %54 = tpu.reciprocal %53 {approx = true} : vector<8x1xf32> -> vector<8x1xf32>
    %55 = vector.broadcast %54 : vector<8x1xf32> to vector<8x8xf32>
    %56 = arith.mulf %51, %55 : vector<8x8xf32>
    %57 = arith.truncf %56 : vector<8x8xf32> to vector<8x8xbf16>
    %58 = arith.truncf %33 : vector<8x32xf32> to vector<8x32xbf16>
    %cst_31 = arith.constant dense<0.000000e+00> : vector<8x32xf32>
    %59 = tpu.matmul %57, %58, %cst_31 {dimension_numbers = #tpu.dot_dimension_numbers<[1], [0], [0], [1], [0, 0, 1, 1], [], []>} : vector<8x8xbf16>, vector<8x32xbf16>, vector<8x32xf32> -> vector<8x32xf32>
    %60 = arith.truncf %59 : vector<8x32xf32> to vector<8x32xbf16>
    %c0_32 = arith.constant 0 : index
    %c0_33 = arith.constant 0 : index
    %61 = vector.load %arg13[%c0_32, %c0_33] : memref<32x32xbf16, #tpu.memory_space<vmem>>, vector<32x32xbf16>
    %cst_34 = arith.constant dense<0.000000e+00> : vector<8x32xf32>
    %62 = tpu.matmul %60, %61, %cst_34 {dimension_numbers = #tpu.dot_dimension_numbers<[1], [0], [0], [1], [0, 0, 1, 1], [], []>} : vector<8x32xbf16>, vector<32x32xbf16>, vector<8x32xf32> -> vector<8x32xf32>
    %63 = arith.addf %24, %62 : vector<8x32xf32>
    %c0_35 = arith.constant 0 : index
    %c0_36 = arith.constant 0 : index
    %c0_37 = arith.constant 0 : index
    %64 = vector.load %arg4[%c0_35, %c0_36, %c0_37] : memref<1x16x32xf32, #tpu.memory_space<vmem>>, vector<1x16x32xf32>
    %65 = vector.shape_cast %64 : vector<1x16x32xf32> to vector<16x32xf32>
    %66 = arith.truncf %65 : vector<16x32xf32> to vector<16x32xbf16>
    %67 = arith.truncf %63 : vector<8x32xf32> to vector<8x32xbf16>
    %c0_38 = arith.constant 0 : index
    %c0_39 = arith.constant 0 : index
    %68 = vector.load %arg14[%c0_38, %c0_39] : memref<32x32xbf16, #tpu.memory_space<vmem>>, vector<32x32xbf16>
    %cst_40 = arith.constant dense<0.000000e+00> : vector<8x32xf32>
    %69 = tpu.matmul %67, %68, %cst_40 {dimension_numbers = #tpu.dot_dimension_numbers<[1], [0], [0], [1], [0, 0, 1, 1], [], []>} : vector<8x32xbf16>, vector<32x32xbf16>, vector<8x32xf32> -> vector<8x32xf32>
    %c0_41 = arith.constant 0 : index
    %c0_42 = arith.constant 0 : index
    %70 = vector.load %arg15[%c0_41, %c0_42] : memref<32x32xbf16, #tpu.memory_space<vmem>>, vector<32x32xbf16>
    %cst_43 = arith.constant dense<0.000000e+00> : vector<16x32xf32>
    %71 = tpu.matmul %66, %70, %cst_43 {dimension_numbers = #tpu.dot_dimension_numbers<[1], [0], [0], [1], [0, 0, 1, 1], [], []>} : vector<16x32xbf16>, vector<32x32xbf16>, vector<16x32xf32> -> vector<16x32xf32>
    %c0_44 = arith.constant 0 : index
    %c0_45 = arith.constant 0 : index
    %72 = vector.load %arg16[%c0_44, %c0_45] : memref<32x32xbf16, #tpu.memory_space<vmem>>, vector<32x32xbf16>
    %cst_46 = arith.constant dense<0.000000e+00> : vector<16x32xf32>
    %73 = tpu.matmul %66, %72, %cst_46 {dimension_numbers = #tpu.dot_dimension_numbers<[1], [0], [0], [1], [0, 0, 1, 1], [], []>} : vector<16x32xbf16>, vector<32x32xbf16>, vector<16x32xf32> -> vector<16x32xf32>
    %74 = arith.truncf %69 : vector<8x32xf32> to vector<8x32xbf16>
    %75 = arith.truncf %71 : vector<16x32xf32> to vector<16x32xbf16>
    %cst_47 = arith.constant dense<0.000000e+00> : vector<8x16xf32>
    %76 = tpu.matmul %74, %75, %cst_47 {dimension_numbers = #tpu.dot_dimension_numbers<[1], [1], [0], [0], [0, 0, 1, 0], [], []>} : vector<8x32xbf16>, vector<16x32xbf16>, vector<8x16xf32> -> vector<8x16xf32>
    %77 = vector.broadcast %26 : f32 to vector<8x16xf32>
    %78 = arith.mulf %76, %77 : vector<8x16xf32>
    %79 = tpu.iota {dimensions = array<i32: 1>} : vector<8x16xi32>
    %80 = vector.broadcast %1 : i32 to vector<8x16xi32>
    %81 = arith.cmpi slt, %79, %80 : vector<8x16xi32>
    %cst_48 = arith.constant -1.000000e+09 : f32
    %82 = vector.broadcast %cst_48 : f32 to vector<8x16xf32>
    %83 = arith.select %81, %78, %82 : vector<8x16xi1>, vector<8x16xf32>
    %cst_49 = arith.constant dense<0xFF800000> : vector<8xf32>
    %84 = vector.multi_reduction <maximumf>, %83, %cst_49 [1] : vector<8x16xf32> to vector<8xf32>
    %85 = vector.shape_cast %84 : vector<8xf32> to vector<8x1xf32>
    %86 = vector.broadcast %85 : vector<8x1xf32> to vector<8x16xf32>
    %87 = arith.subf %83, %86 : vector<8x16xf32>
    %88 = math.exp %87 : vector<8x16xf32>
    %cst_50 = arith.constant dense<0.000000e+00> : vector<8xf32>
    %89 = vector.multi_reduction <add>, %88, %cst_50 [1] : vector<8x16xf32> to vector<8xf32>
    %90 = vector.shape_cast %89 : vector<8xf32> to vector<8x1xf32>
    %91 = tpu.reciprocal %90 {approx = true} : vector<8x1xf32> -> vector<8x1xf32>
    %92 = vector.broadcast %91 : vector<8x1xf32> to vector<8x16xf32>
    %93 = arith.mulf %88, %92 : vector<8x16xf32>
    %94 = arith.truncf %93 : vector<8x16xf32> to vector<8x16xbf16>
    %95 = arith.truncf %73 : vector<16x32xf32> to vector<16x32xbf16>
    %cst_51 = arith.constant dense<0.000000e+00> : vector<8x32xf32>
    %96 = tpu.matmul %94, %95, %cst_51 {dimension_numbers = #tpu.dot_dimension_numbers<[1], [0], [0], [1], [0, 0, 1, 1], [], []>} : vector<8x16xbf16>, vector<16x32xbf16>, vector<8x32xf32> -> vector<8x32xf32>
    %97 = arith.truncf %96 : vector<8x32xf32> to vector<8x32xbf16>
    %c0_52 = arith.constant 0 : index
    %c0_53 = arith.constant 0 : index
    %98 = vector.load %arg17[%c0_52, %c0_53] : memref<32x32xbf16, #tpu.memory_space<vmem>>, vector<32x32xbf16>
    %cst_54 = arith.constant dense<0.000000e+00> : vector<8x32xf32>
    %99 = tpu.matmul %97, %98, %cst_54 {dimension_numbers = #tpu.dot_dimension_numbers<[1], [0], [0], [1], [0, 0, 1, 1], [], []>} : vector<8x32xbf16>, vector<32x32xbf16>, vector<8x32xf32> -> vector<8x32xf32>
    %100 = arith.addf %63, %99 : vector<8x32xf32>
    %101 = arith.truncf %100 : vector<8x32xf32> to vector<8x32xbf16>
    %c0_55 = arith.constant 0 : index
    %c0_56 = arith.constant 0 : index
    %102 = vector.load %arg18[%c0_55, %c0_56] : memref<32x64xbf16, #tpu.memory_space<vmem>>, vector<32x64xbf16>
    %cst_57 = arith.constant dense<0.000000e+00> : vector<8x64xf32>
    %103 = tpu.matmul %101, %102, %cst_57 {dimension_numbers = #tpu.dot_dimension_numbers<[1], [0], [0], [1], [0, 0, 1, 1], [], []>} : vector<8x32xbf16>, vector<32x64xbf16>, vector<8x64xf32> -> vector<8x64xf32>
    %c0_58 = arith.constant 0 : index
    %c0_59 = arith.constant 0 : index
    %104 = vector.load %arg19[%c0_58, %c0_59] : memref<1x64xf32, #tpu.memory_space<vmem>>, vector<1x64xf32>
    %105 = vector.broadcast %104 : vector<1x64xf32> to vector<8x64xf32>
    %106 = arith.addf %103, %105 : vector<8x64xf32>
    %cst_60 = arith.constant 0.000000e+00 : f32
    %107 = vector.broadcast %cst_60 : f32 to vector<8x64xf32>
    %108 = arith.maximumf %106, %107 : vector<8x64xf32>
    %109 = arith.truncf %108 : vector<8x64xf32> to vector<8x64xbf16>
    %c0_61 = arith.constant 0 : index
    %c0_62 = arith.constant 0 : index
    %110 = vector.load %arg20[%c0_61, %c0_62] : memref<64x32xbf16, #tpu.memory_space<vmem>>, vector<64x32xbf16>
    %cst_63 = arith.constant dense<0.000000e+00> : vector<8x32xf32>
    %111 = tpu.matmul %109, %110, %cst_63 {dimension_numbers = #tpu.dot_dimension_numbers<[1], [0], [0], [1], [0, 0, 1, 1], [], []>} : vector<8x64xbf16>, vector<64x32xbf16>, vector<8x32xf32> -> vector<8x32xf32>
    %c0_64 = arith.constant 0 : index
    %c0_65 = arith.constant 0 : index
    %112 = vector.load %arg21[%c0_64, %c0_65] : memref<1x32xf32, #tpu.memory_space<vmem>>, vector<1x32xf32>
    %113 = vector.broadcast %112 : vector<1x32xf32> to vector<8x32xf32>
    %114 = arith.addf %111, %113 : vector<8x32xf32>
    %115 = arith.addf %100, %114 : vector<8x32xf32>
    %116 = arith.truncf %115 : vector<8x32xf32> to vector<8x32xbf16>
    %c0_66 = arith.constant 0 : index
    %c0_67 = arith.constant 0 : index
    %117 = vector.load %arg22[%c0_66, %c0_67] : memref<32x128xbf16, #tpu.memory_space<vmem>>, vector<32x128xbf16>
    %cst_68 = arith.constant dense<0.000000e+00> : vector<8x128xf32>
    %118 = tpu.matmul %116, %117, %cst_68 {dimension_numbers = #tpu.dot_dimension_numbers<[1], [0], [0], [1], [0, 0, 1, 1], [], []>} : vector<8x32xbf16>, vector<32x128xbf16>, vector<8x128xf32> -> vector<8x128xf32>
    %c0_69 = arith.constant 0 : index
    %c0_70 = arith.constant 0 : index
    %119 = vector.load %arg23[%c0_69, %c0_70] : memref<1x128xf32, #tpu.memory_space<vmem>>, vector<1x128xf32>
    %120 = vector.broadcast %119 : vector<1x128xf32> to vector<8x128xf32>
    %121 = arith.addf %118, %120 : vector<8x128xf32>
    %122 = tpu.iota {dimensions = array<i32: 0>} : vector<8x128xi32>
    %123 = vector.broadcast %3 : i32 to vector<8x128xi32>
    %124 = arith.cmpi slt, %122, %123 : vector<8x128xi32>
    %cst_71 = arith.constant 0.000000e+00 : f32
    %125 = vector.broadcast %cst_71 : f32 to vector<8x128xf32>
    %126 = arith.select %124, %121, %125 : vector<8x128xi1>, vector<8x128xf32>
    %c0_72 = arith.constant 0 : index
    %c0_73 = arith.constant 0 : index
    %c0_74 = arith.constant 0 : index
    %127 = vector.load %arg24[%c0_72, %c0_73, %c0_74] : memref<1x8x128xf32, #tpu.memory_space<vmem>>, vector<1x8x128xf32>
    %128 = vector.shape_cast %127 : vector<1x8x128xf32> to vector<8x128xf32>
    %129 = vector.shape_cast %126 : vector<8x128xf32> to vector<1x8x128xf32>
    tpu.vector_store %arg24[%c0_72, %c0_73, %c0_74], %129 {strides = array<i32>} : memref<1x8x128xf32, #tpu.memory_space<vmem>>, vector<1x8x128xf32>,
    %c0_75 = arith.constant 0 : index
    %c0_76 = arith.constant 0 : index
    %c0_77 = arith.constant 0 : index
    %130 = vector.load %arg25[%c0_75, %c0_76, %c0_77] : memref<1x8x16xf32, #tpu.memory_space<vmem>>, vector<1x8x16xf32>
    %131 = vector.shape_cast %130 : vector<1x8x16xf32> to vector<8x16xf32>
    %132 = vector.shape_cast %93 : vector<8x16xf32> to vector<1x8x16xf32>
    tpu.vector_store %arg25[%c0_75, %c0_76, %c0_77], %132 {strides = array<i32>} : memref<1x8x16xf32, #tpu.memory_space<vmem>>, vector<1x8x16xf32>,
    return
  }
  func.func @transform_0(%arg0: i32, %arg1: memref<2xi32, #tpu.memory_space<smem>>, %arg2: memref<2xi32, #tpu.memory_space<smem>>) -> (i32, i32, i32) {
    %c0_i32 = arith.constant 0 : i32
    %c0_i32_0 = arith.constant 0 : i32
    %c0_i32_1 = arith.constant 0 : i32
    return %arg0, %c0_i32, %c0_i32_0 : i32, i32, i32
  }
  func.func @transform_1(%arg0: i32, %arg1: memref<2xi32, #tpu.memory_space<smem>>, %arg2: memref<2xi32, #tpu.memory_space<smem>>) -> (i32, i32, i32) {
    %c0_i32 = arith.constant 0 : i32
    %c0_i32_0 = arith.constant 0 : i32
    %c0_i32_1 = arith.constant 0 : i32
    return %arg0, %c0_i32, %c0_i32_0 : i32, i32, i32
  }
  func.func @transform_2(%arg0: i32, %arg1: memref<2xi32, #tpu.memory_space<smem>>, %arg2: memref<2xi32, #tpu.memory_space<smem>>) -> (i32, i32) {
    %c0_i32 = arith.constant 0 : i32
    %c0_i32_0 = arith.constant 0 : i32
    %c0_i32_1 = arith.constant 0 : i32
    return %c0_i32, %c0_i32_0 : i32, i32
  }
  func.func @transform_3(%arg0: i32, %arg1: memref<2xi32, #tpu.memory_space<smem>>, %arg2: memref<2xi32, #tpu.memory_space<smem>>) -> (i32, i32) {
    %c0_i32 = arith.constant 0 : i32
    %c0_i32_0 = arith.constant 0 : i32
    %c0_i32_1 = arith.constant 0 : i32
    return %c0_i32, %c0_i32_0 : i32, i32
  }
  func.func @transform_4(%arg0: i32, %arg1: memref<2xi32, #tpu.memory_space<smem>>, %arg2: memref<2xi32, #tpu.memory_space<smem>>) -> (i32, i32) {
    %c0_i32 = arith.constant 0 : i32
    %c0_i32_0 = arith.constant 0 : i32
    %c0_i32_1 = arith.constant 0 : i32
    return %c0_i32, %c0_i32_0 : i32, i32
  }
  func.func @transform_5(%arg0: i32, %arg1: memref<2xi32, #tpu.memory_space<smem>>, %arg2: memref<2xi32, #tpu.memory_space<smem>>) -> (i32, i32) {
    %c0_i32 = arith.constant 0 : i32
    %c0_i32_0 = arith.constant 0 : i32
    %c0_i32_1 = arith.constant 0 : i32
    return %c0_i32, %c0_i32_0 : i32, i32
  }
  func.func @transform_6(%arg0: i32, %arg1: memref<2xi32, #tpu.memory_space<smem>>, %arg2: memref<2xi32, #tpu.memory_space<smem>>) -> (i32, i32) {
    %c0_i32 = arith.constant 0 : i32
    %c0_i32_0 = arith.constant 0 : i32
    %c0_i32_1 = arith.constant 0 : i32
    return %c0_i32, %c0_i32_0 : i32, i32
  }
  func.func @transform_7(%arg0: i32, %arg1: memref<2xi32, #tpu.memory_space<smem>>, %arg2: memref<2xi32, #tpu.memory_space<smem>>) -> (i32, i32) {
    %c0_i32 = arith.constant 0 : i32
    %c0_i32_0 = arith.constant 0 : i32
    %c0_i32_1 = arith.constant 0 : i32
    return %c0_i32, %c0_i32_0 : i32, i32
  }
  func.func @transform_8(%arg0: i32, %arg1: memref<2xi32, #tpu.memory_space<smem>>, %arg2: memref<2xi32, #tpu.memory_space<smem>>) -> (i32, i32) {
    %c0_i32 = arith.constant 0 : i32
    %c0_i32_0 = arith.constant 0 : i32
    %c0_i32_1 = arith.constant 0 : i32
    return %c0_i32, %c0_i32_0 : i32, i32
  }
  func.func @transform_9(%arg0: i32, %arg1: memref<2xi32, #tpu.memory_space<smem>>, %arg2: memref<2xi32, #tpu.memory_space<smem>>) -> (i32, i32) {
    %c0_i32 = arith.constant 0 : i32
    %c0_i32_0 = arith.constant 0 : i32
    %c0_i32_1 = arith.constant 0 : i32
    return %c0_i32, %c0_i32_0 : i32, i32
  }
  func.func @transform_10(%arg0: i32, %arg1: memref<2xi32, #tpu.memory_space<smem>>, %arg2: memref<2xi32, #tpu.memory_space<smem>>) -> (i32, i32) {
    %c0_i32 = arith.constant 0 : i32
    %c0_i32_0 = arith.constant 0 : i32
    %c0_i32_1 = arith.constant 0 : i32
    return %c0_i32, %c0_i32_0 : i32, i32
  }
  func.func @transform_11(%arg0: i32, %arg1: memref<2xi32, #tpu.memory_space<smem>>, %arg2: memref<2xi32, #tpu.memory_space<smem>>) -> (i32, i32) {
    %c0_i32 = arith.constant 0 : i32
    %c0_i32_0 = arith.constant 0 : i32
    %c0_i32_1 = arith.constant 0 : i32
    return %c0_i32, %c0_i32_0 : i32, i32
  }
  func.func @transform_12(%arg0: i32, %arg1: memref<2xi32, #tpu.memory_space<smem>>, %arg2: memref<2xi32, #tpu.memory_space<smem>>) -> (i32, i32) {
    %c0_i32 = arith.constant 0 : i32
    %c0_i32_0 = arith.constant 0 : i32
    %c0_i32_1 = arith.constant 0 : i32
    return %c0_i32, %c0_i32_0 : i32, i32
  }
  func.func @transform_13(%arg0: i32, %arg1: memref<2xi32, #tpu.memory_space<smem>>, %arg2: memref<2xi32, #tpu.memory_space<smem>>) -> (i32, i32) {
    %c0_i32 = arith.constant 0 : i32
    %c0_i32_0 = arith.constant 0 : i32
    %c0_i32_1 = arith.constant 0 : i32
    return %c0_i32, %c0_i32_0 : i32, i32
  }
  func.func @transform_14(%arg0: i32, %arg1: memref<2xi32, #tpu.memory_space<smem>>, %arg2: memref<2xi32, #tpu.memory_space<smem>>) -> (i32, i32) {
    %c0_i32 = arith.constant 0 : i32
    %c0_i32_0 = arith.constant 0 : i32
    %c0_i32_1 = arith.constant 0 : i32
    return %c0_i32, %c0_i32_0 : i32, i32
  }
  func.func @transform_15(%arg0: i32, %arg1: memref<2xi32, #tpu.memory_space<smem>>, %arg2: memref<2xi32, #tpu.memory_space<smem>>) -> (i32, i32) {
    %c0_i32 = arith.constant 0 : i32
    %c0_i32_0 = arith.constant 0 : i32
    %c0_i32_1 = arith.constant 0 : i32
    return %c0_i32, %c0_i32_0 : i32, i32
  }
  func.func @transform_16(%arg0: i32, %arg1: memref<2xi32, #tpu.memory_space<smem>>, %arg2: memref<2xi32, #tpu.memory_space<smem>>) -> (i32, i32) {
    %c0_i32 = arith.constant 0 : i32
    %c0_i32_0 = arith.constant 0 : i32
    %c0_i32_1 = arith.constant 0 : i32
    return %c0_i32, %c0_i32_0 : i32, i32
  }
  func.func @transform_17(%arg0: i32, %arg1: memref<2xi32, #tpu.memory_space<smem>>, %arg2: memref<2xi32, #tpu.memory_space<smem>>) -> (i32, i32) {
    %c0_i32 = arith.constant 0 : i32
    %c0_i32_0 = arith.constant 0 : i32
    %c0_i32_1 = arith.constant 0 : i32
    return %c0_i32, %c0_i32_0 : i32, i32
  }
  func.func @transform_18(%arg0: i32, %arg1: memref<2xi32, #tpu.memory_space<smem>>, %arg2: memref<2xi32, #tpu.memory_space<smem>>) -> (i32, i32) {
    %c0_i32 = arith.constant 0 : i32
    %c0_i32_0 = arith.constant 0 : i32
    %c0_i32_1 = arith.constant 0 : i32
    return %c0_i32, %c0_i32_0 : i32, i32
  }
  func.func @transform_19(%arg0: i32, %arg1: memref<2xi32, #tpu.memory_space<smem>>, %arg2: memref<2xi32, #tpu.memory_space<smem>>) -> (i32, i32) {
    %c0_i32 = arith.constant 0 : i32
    %c0_i32_0 = arith.constant 0 : i32
    %c0_i32_1 = arith.constant 0 : i32
    return %c0_i32, %c0_i32_0 : i32, i32
  }
  func.func @transform_20(%arg0: i32, %arg1: memref<2xi32, #tpu.memory_space<smem>>, %arg2: memref<2xi32, #tpu.memory_space<smem>>) -> (i32, i32) {
    %c0_i32 = arith.constant 0 : i32
    %c0_i32_0 = arith.constant 0 : i32
    %c0_i32_1 = arith.constant 0 : i32
    return %c0_i32, %c0_i32_0 : i32, i32
  }
  func.func @transform_21(%arg0: i32, %arg1: memref<2xi32, #tpu.memory_space<smem>>, %arg2: memref<2xi32, #tpu.memory_space<smem>>) -> (i32, i32, i32) {
    %c0_i32 = arith.constant 0 : i32
    %c0_i32_0 = arith.constant 0 : i32
    %c0_i32_1 = arith.constant 0 : i32
    return %arg0, %c0_i32, %c0_i32_0 : i32, i32, i32
  }
  func.func @transform_22(%arg0: i32, %arg1: memref<2xi32, #tpu.memory_space<smem>>, %arg2: memref<2xi32, #tpu.memory_space<smem>>) -> (i32, i32, i32) {
    %c0_i32 = arith.constant 0 : i32
    %c0_i32_0 = arith.constant 0 : i32
    %c0_i32_1 = arith.constant 0 : i32
    return %arg0, %c0_i32, %c0_i32_0 : i32, i32, i32
  }
}

</mosaic_0001>

<bundles_post_ra>
// kernel: decoder_forward.1
= control target key start
LH: loop header
LB: loop body
LE: loop exit
PB: predicated region body
PF: predicated region fallthrough
CT: control target
= control target key end

     0   :  { %s2847_s0 = inlined_call_operand.vmem [shape: s32[2], index: 0, kind: input, shape index: {}]   ;;  %s2848_s2 = inlined_call_operand.vmem [shape: f32[2,8,8], index: 2, kind: input, shape index: {}]   ;;  %s2849_s3 = inlined_call_operand.vmem [shape: f32[2,16,32], index: 3, kind: input, shape index: {}]   ;;  %s2850_s4 = inlined_call_operand.vmem [shape: bf16[8,32], index: 4, kind: input, shape index: {}]   ;;  %s2851_s5 = inlined_call_operand.vmem [shape: f32[1,32], index: 5, kind: input, shape index: {}]   ;;  %s2852_s6 = inlined_call_operand.vmem [shape: bf16[32,32], index: 6, kind: input, shape index: {}]   ;;  %s2853_s7 = inlined_call_operand.vmem [shape: f32[1,32], index: 7, kind: input, shape index: {}]   ;;  %s2854_s8 = inlined_call_operand.vmem [shape: bf16[32,32], index: 8, kind: input, shape index: {}]   ;;  %s2855_s9 = inlined_call_operand.vmem [shape: bf16[32,32], index: 9, kind: input, shape index: {}]   ;;  %s2856_s10 = inlined_call_operand.vmem [shape: bf16[32,32], index: 10, kind: input, shape index: {}]   ;;  %s2857_s11 = inlined_call_operand.vmem [shape: bf16[32,32], index: 11, kind: input, shape index: {}]   ;;  %s2858_s12 = inlined_call_operand.vmem [shape: bf16[32,32], index: 12, kind: input, shape index: {}]   ;;  %s2859_s13 = inlined_call_operand.vmem [shape: bf16[32,32], index: 13, kind: input, shape index: {}]   ;;  %s2860_s14 = inlined_call_operand.vmem [shape: bf16[32,32], index: 14, kind: input, shape index: {}]   ;;  %s2861_s15 = inlined_call_operand.vmem [shape: bf16[32,32], index: 15, kind: input, shape index: {}]   ;;  %s2862_s16 = inlined_call_operand.vmem [shape: bf16[32,32], index: 16, kind: input, shape index: {}]   ;;  %s2863_s17 = inlined_call_operand.vmem [shape: bf16[32,64], index: 17, kind: input, shape index: {}]   ;;  %s2864_s18 = inlined_call_operand.vmem [shape: f32[1,64], index: 18, kind: input, shape index: {}]   ;;  %s2865_s19 = inlined_call_operand.vmem [shape: bf16[64,32], index: 19, kind: input, shape index: {}]   ;;  %s2866_s20 = inlined_call_operand.vmem [shape: f32[1,32], index: 20, kind: input, shape index: {}]   ;;  %s2867_s21 = inlined_call_operand.vmem [shape: bf16[32,128], index: 21, kind: input, shape index: {}]   ;;  %s2868_s22 = inlined_call_operand.vmem [shape: f32[1,128], index: 22, kind: input, shape index: {}]   ;;  %s2869_s23 = inlined_call_operand.vmem [shape: f32[2,8,128], index: 23, kind: output, shape index: {0}]   ;;  %s2870_s24 = inlined_call_operand.hbm [shape: f32[2,8,16], index: 24, kind: output, shape index: {1}]   ;;  %s2871_s1 = inlined_call_operand.vmem [shape: s32[2], index: 1, kind: input, shape index: {}]  }
   0x1   :  { %2881 = sst [smem:[#allocation12_spill]] %s2847_s0 }
   0x2   :  { %2882 = sst [smem:[#allocation13_spill]] %s2848_s2 }
   0x3   :  { %2883 = sst [smem:[#allocation14_spill]] %s2849_s3  ;;  %s34_s3 = sshll.u32 %s2871_s1, 4  ;;  %s35_s3 = int_to_ptr.vmem [resolvable:$true] %s34_s3 }
   0x4   :  { %2884 = sst [smem:[#allocation15_spill]] %s2850_s4 }
   0x5   :  { %2885 = sst [smem:[#allocation16_spill]] %s2851_s5 }
   0x6   :  { %2886 = sst [smem:[#allocation17_spill]] %s2852_s6 }
   0x7   :  { %2887 = sst [smem:[#allocation18_spill]] %s2853_s7 }
   0x8   :  { %2888 = sst [smem:[#allocation19_spill]] %s2854_s8 }
   0x9   :  { %2889 = sst [smem:[#allocation20_spill]] %s2855_s9 }
   0xa   :  { %2890 = sst [smem:[#allocation21_spill]] %s2856_s10 }
   0xb   :  { %2891 = sst [smem:[#allocation22_spill]] %s2857_s11 }
   0xc   :  { %2892 = sst [smem:[#allocation23_spill]] %s2858_s12 }
   0xd   :  { %2893 = sst [smem:[#allocation24_spill]] %s2859_s13 }
   0xe   :  { %2894 = sst [smem:[#allocation25_spill]] %s2860_s14 }
   0xf   :  { %2895 = sst [smem:[#allocation26_spill]] %s2861_s15 }
  0x10   :  { %2896 = sst [smem:[#allocation27_spill]] %s2864_s18 }
  0x11   :  { %s2897_s27 = sld [smem:[#allocation12_spill]] }
  0x17   :  { %s30_s18 = sshll.u32 %s2897_s27, 4  ;;  %s31_s18 = int_to_ptr.vmem [resolvable:$true] %s30_s18 }
  0x18   :  { %s2286_s29 = scalar_lea.vmem %s31_s18, 16  ;;  %p2291_p1 = scmp.lt.s32.totalorder %s31_s18, %s31_s18 }
  0x19   :  { %p2287_p0 = scmp.ne.s32.totalorder %s31_s18, %s2286_s29  ;;  %p2292_p2 = scmp.lt.s32.totalorder %s2286_s29, %s2286_s29 }
  0x1b   :  { %p2293_p3 = por %p2292_p2, %p2291_p1 }
  0x1d   :  { %p2294_p4 = pnand %p2293_p3, %p2287_p0 }
  0x1f   :  { %2297 = shalt.err (!%p2294_p4)  }
  0x20   :  { %s2374_s0 = smov [#allocation3]   ;;  %s2298_s8 = scalar_lea.vmem %s35_s3, 16 }
  0x21   :  { %33 = dma.vmem_to_smem %s31_s18, 16, %s2374_s0, [#allocation2] }
  0x22   :  { %p2299_p5 = scmp.ne.s32.totalorder %s35_s3, %s2298_s8  ;;  %p2303_p6 = scmp.lt.s32.totalorder %s35_s3, %s35_s3 }
  0x23   :  { %p2304_p7 = scmp.lt.s32.totalorder %s2298_s8, %s2298_s8 }
  0x25   :  { %p2305_p8 = por %p2304_p7, %p2303_p6 }
  0x27   :  { %p2306_p9 = pnand %p2305_p8, %p2299_p5 }
  0x29   :  { %2309 = shalt.err (!%p2306_p9)  }
  0x2a   :  { %s2375_s30 = smov [#allocation4]  }
  0x2b   :  { %37 = dma.vmem_to_smem %s35_s3, 16, %s2375_s30, [#allocation2] }
  0x2c   :  { %2352 = dma.done.wait [#allocation2], 32 }
  0x2d   :  { %2353 = vsyncadd [#allocation2], 4294967264 }
  0x2e   :  { %39 = sfence }
  0x2f   :  { %40 = vsyncpa [#allocation6], 0 }
  0x30   :  { %42 = vsyncpa [#allocation6 + $0x1], 0  ;;  %s2510_s1 = smov 0   ;;  %s2512_s4 = smov 0  }
  0x31   :  { %s2514_s25 = smov 0   ;;  %s2516_s18 = smov 0  }
  0x32 LB: > { %2898 = sst [smem:[#allocation9_spill]] %s2368_s25  ;;  %s2531_s9 = sadd.s32 4294967295, %s2372_s18   ;;  %s2372_s18 = sphi %s2516_s18, %s2920_s18   ;;  %s2368_s25 = sphi %s2514_s25, %s2922_s25   ;;  %s2364_s4 = sphi %s2512_s4, %s2924_s4   ;;  %s2360_s1 = sphi %s2510_s1, %s2923_s1  }
  0x33   : > { %s1953_s5 = sadd.s32 4294967294, %s2372_s18   ;;  %s2535_s2 = sadd.s32 1, %s2372_s18  }
  0x34   : > { %2899 = sst [smem:[#allocation10_spill]] %s2535_s2  ;;  %s532_s6 = sadd.s32 1, %s2368_s25 }
  0x35   : > { %s529_s26 = ssub.s32 %s2372_s18, %s2535_s2  ;;  %p542_p10 = scmp.ne.s32.totalorder %s2368_s25, %s2364_s4 }
  0x36   : > { %p530_p11 = scmp.eq.s32.totalorder %s529_s26, 0  ;;  %p543_p12 = scmp.eq.s32.totalorder %s2531_s9, 1 }
  0x37   : > { %p548_p13 = scmp.ne.s32.totalorder %s2364_s4, %s2360_s1  ;;  %p549_p0 = scmp.eq.s32.totalorder %s1953_s5, 1 }
  0x38   : > { %s2546_s27 = scalar_select %p530_p11, %s2368_s25, %s532_s6  }
  0x39   : > { %p2548_p1 = por %p543_p12, %p542_p10  ;;  %p2552_p2 = por %p549_p0, %p548_p13 }
  0x3a   : > { %2900 = sst [smem:[#allocation11_spill]] %s2546_s27  ;;  %p1956_p3 = scmp.ge.s32.totalorder %s2372_s18, 1 }
  0x3b   : > { %p639_p4 = scmp.lt.s32.totalorder %s2372_s18, 3 }
  0x3d   : > { %p640_p5 = pnand %p1956_p3, %p639_p4 }
  0x3e   : > { %s2903_s0 = sld [smem:[#allocation15_spill]] (!%p640_p5)  ;;  %p709_p6 = scmp.lt.s32.totalorder (!%p640_p5), %s2531_s9, 1 }
  0x3f   : > { %643 = sbr.rel (%p640_p5) target bundleno = 3467 (0xd8b), region = 104  ;;  %s2904_s26 = sld [smem:[#allocation13_spill]] (!%p640_p5) }
  0x40   : > { %s2905_s27 = sld [smem:[#allocation17_spill]] (!%p640_p5)  ;;  %s2918_s25 = sand.u32 (!%p640_p5), 1, %s2364_s4  }
  0x41   : > { %s2909_s2 = sld [smem:[#allocation18_spill]] (!%p640_p5) }
  0x42   : > { %s2910_s10 = sld [smem:[#allocation21_spill]] (!%p640_p5) }
  0x43   : > { %s2911_s11 = sld [smem:[#allocation22_spill]] (!%p640_p5) }
  0x44   : > { %v727_v0 = vld [vmem:[%s2903_s0] sm:$0xf]  ;;  %vm739_vm0 = vcmask 1043456   ;;  %v2376_v1 = vmov 0.0   ;;  %vm2377_vm1 = vmmov 0   ;;  %s2567_s8 = scalar_select %p709_p6, %s2531_s9, 1  ;;  %v1134_v53 = vlaneseq }
  0x45   : > { %2069 = vmatprep.subr.bf16.mxu0 %v2376_v1  ;;  %v741_v2 = vsel %vm739_vm0, %v727_v0, 0  ;;  %2071 = vmatprep.mubr.msk.bf16.mxu0 %vm2377_vm1, %v2376_v1  ;;  %vm735_vm2 = vcmask 64512   ;;  %vm808_vm3 = vcmask 261120   ;;  %s2655_s5 = sld [smem:[#allocation4 + %s2531_s9]]  ;;  %vm1495_vm8 = vcmask 130048  }
  0x46   : > { %2070 = vmatpush3.bf16.msra.mxu0 %v741_v2  ;;  %2075 = vmatprep.subr.bf16.mxu1 %v2376_v1  ;;  %s2878_s30 = sshll.u32 %s2567_s8, 3  ;;  %v2250_v5 = vld [vmem:[%s2905_s27 + $0x8] sm:$0xff]   ;;  %v2251_v6 = vld [vmem:[%s2905_s27] sm:$0xff]   ;;  %v2657_v54 = vshrl.u32 %v1134_v53, 7  ;;  %v2659_v55 = vand.u32 127, %v1134_v53  ;;  %s2912_s12 = sld [smem:[#allocation23_spill]] }
  0x47   : > { %2079 = vmatprep.mubr.msk.bf16.mxu1 %vm2377_vm1, %v2376_v1  ;;  %2083 = vmatprep.subr.bf16.mxu0 %v2376_v1  ;;  %s712_s3 = scalar_lea.vmem %s2904_s26, %s2878_s30  ;;  %s2906_s26 = sld [smem:[#allocation16_spill]]  ;;  %v1964_v18 = vld [vmem:[%s2909_s2] ss:$0 sm:$0xff]  ;;  %vm1721_vm9 = vcmask 523264  }
  0x48   : > { %v725_v3 = vld [vmem:[%s712_s3] sm:$0xff]  ;;  %2076 = vmatpush3.bf16.msra.mxu1 %v2250_v5  ;;  %s2907_s3 = sld [smem:[#allocation19_spill]]  ;;  %v2255_v24 = vld [vmem:[%s2910_s10 + $0x8] sm:$0xff]   ;;  %vm1138_vm4 = vcmp.le.s32.totalorder %v2659_v55, %v2657_v54  ;;  %s2017_s6 = sshll.u32 %s2567_s8, 4 }
  0x49   : > { %v726_v4 = vpack.c.bf16 %v725_v3, %v725_v3  ;;  %2077 = vmatprep.subr.bf16.mxu1 %v2376_v1  ;;  %v2257_v28 = vld [vmem:[%s2910_s10] sm:$0xff]   ;;  %v2258_v30 = vld [vmem:[%s2911_s11 + $0x8] sm:$0xff]   ;;  %s2913_s13 = sld [smem:[#allocation24_spill]]  ;;  %s2880_s10 = sand.u32 1, %s2364_s4  }
  0x4a   : > { %v2259_v34 = vld [vmem:[%s2911_s11] sm:$0xff]   ;;  %s2914_s14 = sld [smem:[#allocation25_spill]]  ;;  %s2742_s11 = sshll.u32 %s2880_s10, 3 }
  0x4b   : > { %2072 = vmatmul.mubr.msk.bf16.vlgmr.msra.gmra.mxu0 %vm735_vm2, %v726_v4  ;;  %v1139_v56 = vstv %s2655_s5  ;;  %s2915_s2 = sld [smem:[#allocation14_spill]] }
  0x4c   : > { %2087 = vmatprep.mubr.msk.bf16.mxu0 %vm2377_vm1, %v2376_v1  ;;  %2078 = vmatpush3.bf16.msra.mxu1 %v2251_v6  ;;  %vm1140_vm5 = vcmp.lt.s32.totalorder %v2659_v55, %v1139_v56  ;;  %v2260_v6 = vld [vmem:[%s2912_s12 + $0x8] sm:$0xff]   ;;  %s2916_s15 = sld [smem:[#allocation26_spill]] }
  0x4d   : > { %2091 = vmatprep.subr.bf16.mxu1 %v2376_v1  ;;  %v1962_v7 = vld [vmem:[%s2906_s26] ss:$0 sm:$0xff]  ;;  %s2908_s26 = sld [smem:[#allocation20_spill]]  ;;  %vm1141_vm6 = vmand %vm1138_vm4, %vm1140_vm5 }
  0x4e   : > { %v2252_v15 = vld [vmem:[%s2907_s3 + $0x8] sm:$0xff]   ;;  %v2253_v16 = vld [vmem:[%s2907_s3] sm:$0xff]   ;;  %s708_s3 = scalar_lea.vmem [#allocation5], %s2742_s11  ;;  %s2917_s10 = sld [smem:[#allocation27_spill]] }
  0x4f   : > { %2084 = vmatpush3.bf16.msra.mxu0 %v2252_v15  ;;  %s1858_s0 = sshll.u32 %s708_s3, 4  ;;  %s1859_s0 = int_to_ptr.vmem [resolvable:$true] %s1858_s0 }
  0x50   : > { %2085 = vmatprep.subr.bf16.mxu0 %v2376_v1 }
  0x51   : > { %s717_s29 = scalar_lea.vmem %s2915_s2, %s2017_s6  ;;  %s1842_s2 = scalar_lea.sflag [#allocation6], %s2918_s25 }
  0x53   : > { %2086 = vmatpush3.bf16.msra.mxu0 %v2253_v16  ;;  %v2254_v17 = vld [vmem:[%s2908_s26 + $0x8] sm:$0xff]   ;;  %v2256_v27 = vld [vmem:[%s2908_s26] sm:$0xff]  }
  0x54   : > { %2099 = vmatprep.subr.bf16.mxu0 %v2376_v1 }
 0x10b   : > { %v777_v8 = vpop.f32.mrf.mxu0 }
 0x10c   : > { %v778_v9 = vadd.f32 %v1962_v7, %v777_v8 }
 0x10d   : > { %v2073_v10 = vpop.f32.mrf.mxu0 }
 0x10e   : > { %v783_v11 = vmax.f32 %v778_v9, 0.0 }
 0x10f   : > { %v780_v12 = vpop.f32.mrf.mxu0 }
 0x110   : > { %v784_v13 = vpack.c.bf16 %v783_v11, %v783_v11  ;;  %v2261_v11 = vld [vmem:[%s2912_s12] sm:$0xff]   ;;  %v2264_v12 = vld [vmem:[%s2913_s13 + $0x8] sm:$0xff]   ;;  %s2310_s12 = scalar_lea.vmem %s1859_s0, 128 }
 0x111   : > { %v2074_v14 = vpop.f32.mrf.mxu0  ;;  %p2311_p7 = scmp.ne.s32.totalorder %s1859_s0, %s2310_s12 }
 0x112   : > { %2080 = vmatmul.mubr.msk.bf16.vlgmr.msra.gmra.mxu1 %vm808_vm3, %v784_v13  ;;  %v2262_v14 = vld [vmem:[%s2914_s14 + $0x8] sm:$0xff]  }
 0x113   : > { %2095 = vmatprep.mubr.msk.bf16.mxu1 %vm2377_vm1, %v2376_v1  ;;  %2092 = vmatpush3.bf16.msra.mxu1 %v2254_v17  ;;  %p2312_p8 = pnand %p2311_p7, %p2548_p1 }
 0x114   : > { %2093 = vmatprep.subr.bf16.mxu1 %v2376_v1 }
 0x115   : > { %p2313_p9 = pneg %p2312_p8 }
 0x117   : > { %2094 = vmatpush3.bf16.msra.mxu1 %v2256_v27 }
 0x118   : > { %2107 = vmatprep.subr.bf16.mxu1 %v2376_v1 }
 0x1d2   : > { %v846_v19 = vpop.f32.mrf.mxu1 }
 0x1d3   : > { %v847_v20 = vadd.f32 %v1964_v18, %v846_v19  ;;  %v2263_v18 = vld [vmem:[%s2914_s14] sm:$0xff]  }
 0x1d4   : > { %v2081_v21 = vpop.f32.mrf.mxu1  ;;  %v1263_v19 = vld [vmem:[%s717_s29] sm:$0xff] }
 0x1d5   : > { %v852_v22 = vmax.f32 %v847_v20, 0.0  ;;  %v1264_v20 = vld [vmem:[%s717_s29 + $0x8] sm:$0xff]  ;;  %s723_s29 = sld [smem:[#allocation3 + %s2531_s9]] }
 0x1d6   : > { %v849_v23 = vpop.f32.mrf.mxu1 }
 0x1d7   : > { %v853_v25 = vpack.c.bf16 %v852_v22, %v852_v22  ;;  %v1265_v22 = vpack.c.bf16 %v1264_v20, %v1263_v19  ;;  %v2265_v23 = vld [vmem:[%s2913_s13] sm:$0xff]   ;;  %s2378_s13 = smov [#allocation5]  }
 0x1d8   : > { %v2082_v26 = vpop.f32.mrf.mxu1  ;;  %s2314_s14 = sshll.u32 %s2378_s13, 4  ;;  %s2315_s14 = int_to_ptr.vmem [resolvable:$false] %s2314_s14 }
 0x1d9   : > { %2088 = vmatmul.mubr.msk.bf16.vlgmr.msra.gmra.mxu0 %vm808_vm3, %v853_v25  ;;  %p2317_p10 = scmp.lt.s32.totalorder %s1859_s0, %s2315_s14 }
 0x1da   : > { %2100 = vmatpush3.bf16.msra.mxu0 %v2255_v24  ;;  %2103 = vmatprep.mubr.msk.bf16.mxu0 %vm2377_vm1, %v2376_v1 }
 0x1db   : > { %2101 = vmatprep.subr.bf16.mxu0 %v2376_v1 }
 0x1de   : > { %2102 = vmatpush3.bf16.msra.mxu0 %v2257_v28 }
 0x1df   : > { %2115 = vmatprep.subr.bf16.mxu0 %v2376_v1 }
 0x299   : > { %v2626_v29 = vpop.f32.mrf.mxu0 }
 0x29a   : > { %v913_v31 = vpack.c.bf16 %v2626_v29, %v2626_v29 }
 0x29b   : > { %v2089_v32 = vpop.f32.mrf.mxu0 }
 0x29c   : > { %2096 = vmatmul.mubr.msk.bf16.vlgmr.msra.gmra.mxu1 %vm808_vm3, %v913_v31  ;;  %2104 = vmatmul.mubr.msk.bf16.vlgmr.msra.gmra.mxu0 %vm808_vm3, %v913_v31 }
 0x29d   : > { %v910_v33 = vpop.f32.mrf.mxu0  ;;  %2108 = vmatpush3.bf16.msra.mxu1 %v2258_v30  ;;  %2111 = vmatprep.mubr.msk.bf16.mxu1 %vm2377_vm1, %v2376_v1 }
 0x29e   : > { %2109 = vmatprep.subr.bf16.mxu1 %v2376_v1  ;;  %2117 = vmatprep.mubr.msk.bf16.mxu0 %vm2377_vm1, %v2376_v1 }
 0x29f   : > { %v2090_v35 = vpop.f32.mrf.mxu0 }
 0x2a1   : > { %2110 = vmatpush3.bf16.msra.mxu1 %v2259_v34 }
 0x2a2   : > { %2121 = vmatprep.subr.bf16.mxu1 %v2376_v1 }
 0x2a4   : > { %2112 = vmatmul.mubr.msk.bf16.vlgmr.msra.gmra.mxu1 %vm808_vm3, %v913_v31 }
 0x2a5   : > { %2123 = vmatprep.mubr.msk.bf16.mxu1 %vm2377_vm1, %v2376_v1 }
 0x35c   : > { %v967_v36 = vpop.f32.mrf.mxu1  ;;  %v1023_v37 = vpop.f32.mrf.mxu0 }
 0x35d   : > { %v1086_v38 = vpack.c.bf16 %v1023_v37, %v1023_v37  ;;  %v1085_v47 = vpack.c.bf16 %v967_v36, %v967_v36 }
 0x35e   : > { %v2097_v39 = vpop.f32.mrf.mxu1  ;;  %v2105_v40 = vpop.f32.mrf.mxu0 }
 0x35f   : > { %v1091_v41 = vsel %vm808_vm3, %v1086_v38, 0 }
 0x360   : > { %v970_v42 = vpop.f32.mrf.mxu1  ;;  %v1026_v43 = vpop.f32.mrf.mxu0  ;;  %2116 = vmatpush3.bf16.xpose.msra.mxu0 %v1091_v41  ;;  %v2266_v41 = vld [vmem:[%s2916_s15 + $0x8] sm:$0xff]  }
 0x361   : > { %2127 = vmatprep.subr.bf16.mxu0 %v2376_v1  ;;  %v2267_v42 = vld [vmem:[%s2916_s15] sm:$0xff]   ;;  %v1492_v43 = vstv %s723_s29  ;;  %s2014_s29 = sshll.u32 %s2531_s9, 7  ;;  %s2316_s15 = scalar_lea.vmem %s2315_s14, 256 }
 0x362   : > { %v2098_v44 = vpop.f32.mrf.mxu1  ;;  %v2106_v45 = vpop.f32.mrf.mxu0  ;;  %vm1493_vm7 = vcmp.lt.s32.totalorder %v2659_v55, %v1492_v43  ;;  %p2318_p11 = scmp.lt.s32.totalorder %s2316_s15, %s2310_s12 }
 0x364   : > { %v1079_v46 = vpop.f32.mrf.mxu1  ;;  %p2319_p12 = por %p2318_p11, %p2317_p10 }
 0x365   : > { %v1155_v48 = vpack.c.bf16 %v1079_v46, %v1079_v46 }
 0x366   : > { %v2113_v49 = vpop.f32.mrf.mxu1  ;;  %p2320_p13 = pnand %p2319_p12, %p2313_p9 }
 0x367   : > { %v1160_v50 = vsel %vm739_vm0, %v1155_v48, 0  ;;  %2118 = vmatmul.mubr.msk.bf16.vlgmr.msra.gmra.mxu0 %vm808_vm3, %v1085_v47 }
 0x368   : > { %v1082_v51 = vpop.f32.mrf.mxu1  ;;  %2122 = vmatpush3.bf16.msra.mxu1 %v1160_v50  ;;  %2131 = vmatprep.mubr.msk.bf16.mxu0 %vm2377_vm1, %v2376_v1 }
 0x369   : > { %2135 = vmatprep.subr.bf16.mxu1 %v2376_v1  ;;  %2128 = vmatpush3.bf16.msra.mxu0 %v2260_v6  ;;  %v2270_v6 = vld [vmem:[%s2863_s17 + $0x8] sm:$0xff]  }
 0x36a   : > { %v2114_v52 = vpop.f32.mrf.mxu1  ;;  %2129 = vmatprep.subr.bf16.mxu0 %v2376_v1 }
 0x36d   : > { %2130 = vmatpush3.bf16.msra.mxu0 %v2261_v11 }
 0x36e   : > { %2143 = vmatprep.subr.bf16.mxu0 %v2376_v1 }
 0x427   : > { %v1127_v57 = vpop.f32.mrf.mxu0 }
 0x428   : > { %v1133_v58 = vmul.f32 0.17677669, %v1127_v57 }
 0x429   : > { %v2119_v59 = vpop.f32.mrf.mxu0 }
 0x42a   : > { %v1142_v60 = vsel %vm1141_vm6, %v1133_v58, -1e+09 }
 0x42b   : > { %v1130_v61 = vpop.f32.mrf.mxu0  ;;  %v1143_v62 = vsel %vm735_vm2, %v1142_v60, -inf }
 0x42c   : > { %1144 = vmax.xlane.f32.xlu0 %v1143_v62 }
 0x42d   : > { %v2120_v63 = vpop.f32.mrf.mxu0 }
 0x42e   : > { %v2268_v63 = vld [vmem:[%s2862_s16 + $0x8] sm:$0xff]  }
 0x4b5   : > { %v1145_v0 = vpop.xlane.xlu0 %1144 }
 0x4b6   : > { %v1146_v2 = vsub.f32 %v1142_v60, %v1145_v0 }
 0x4b8   : > { %v1147_v3 = vmul.f32 1.442695, %v1146_v2 }
 0x4ba   : > { %2278 = vpow2.f32 %v1147_v3 }
 0x4c7   : > { %v2279_v4 = vpop.eup %2278 }
 0x4c8   : > { %v1149_v5 = vsel %vm735_vm2, %v2279_v4, 0.0 }
 0x4c9   : > { %1150 = vadd.xlane.f32.xlu0 %v1149_v5  ;;  %v2269_v5 = vld [vmem:[%s2862_s16] sm:$0xff]  }
 0x552   : > { %v1151_v7 = vpop.xlane.xlu0 %1150 }
 0x553   : > { %2280 = vrcp.f32 %v1151_v7 }
 0x560   : > { %v2281_v8 = vpop.eup %2280 }
 0x561   : > { %v1153_v9 = vmul.f32 %v2281_v8, %v2279_v4 }
 0x563   : > { %v1154_v10 = vpack.c.bf16 %v1153_v9, %v1153_v9 }
 0x565   : > { %2124 = vmatmul.mubr.msk.bf16.vlgmr.msra.gmra.mxu1 %vm735_vm2, %v1154_v10 }
 0x566   : > { %2139 = vmatprep.mubr.msk.bf16.mxu1 %vm2377_vm1, %v2376_v1  ;;  %2136 = vmatpush3.bf16.msra.mxu1 %v2264_v12  ;;  %v2271_v12 = vld [vmem:[%s2863_s17] sm:$0xff]  }
 0x567   : > { %2137 = vmatprep.subr.bf16.mxu1 %v2376_v1 }
 0x56a   : > { %2138 = vmatpush3.bf16.msra.mxu1 %v2265_v23  ;;  %v1999_v23 = vld [vmem:[%s2917_s10] ss:$0 sm:$0xff]  ;;  %s1856_s10 = scalar_lea.hbm %s2870_s24, %s2014_s29 }
 0x56b   : > { %2151 = vmatprep.subr.bf16.mxu1 %v2376_v1 }
 0x625   : > { %v1196_v13 = vpop.f32.mrf.mxu1 }
 0x626   : > { %v1202_v15 = vpack.c.bf16 %v1196_v13, %v1196_v13  ;;  %v2272_v13 = vld [vmem:[%s2865_s19 + $0x18] sm:$0xff]  }
 0x627   : > { %v2125_v16 = vpop.f32.mrf.mxu1 }
 0x628   : > { %2132 = vmatmul.mubr.msk.bf16.vlgmr.msra.gmra.mxu0 %vm808_vm3, %v1202_v15 }
 0x629   : > { %v1199_v17 = vpop.f32.mrf.mxu1  ;;  %2144 = vmatpush3.bf16.msra.mxu0 %v2262_v14  ;;  %2147 = vmatprep.mubr.msk.bf16.mxu0 %vm2377_vm1, %v2376_v1  ;;  %v2273_v14 = vld [vmem:[%s2865_s19 + $0x10] sm:$0xff]  }
 0x62a   : > { %2145 = vmatprep.subr.bf16.mxu0 %v2376_v1 }
 0x62b   : > { %v2126_v21 = vpop.f32.mrf.mxu1 }
 0x62c   : > { %v2274_v21 = vld [vmem:[%s2865_s19 + $0x8] sm:$0xff]  }
 0x62d   : > { %2146 = vmatpush3.bf16.msra.mxu0 %v2263_v18 }
 0x62e   : > { %2159 = vmatprep.subr.bf16.mxu0 %v2376_v1 }
 0x630   : > { %2148 = vmatmul.mubr.msk.bf16.vlgmr.msra.gmra.mxu0 %vm808_vm3, %v1265_v22 }
 0x631   : > { %2161 = vmatprep.mubr.msk.bf16.mxu0 %vm2377_vm1, %v2376_v1 }
 0x6e8   : > { %v1256_v24 = vpop.f32.mrf.mxu0 }
 0x6e9   : > { %v2707_v25 = vadd.f32 %v1256_v24, %v2626_v29 }
 0x6ea   : > { %v2133_v26 = vpop.f32.mrf.mxu0 }
 0x6eb   : > { %v1266_v27 = vpack.c.bf16 %v2707_v25, %v2707_v25 }
 0x6ec   : > { %v1259_v28 = vpop.f32.mrf.mxu0 }
 0x6ed   : > { %2140 = vmatmul.mubr.msk.bf16.vlgmr.msra.gmra.mxu1 %vm808_vm3, %v1266_v27 }
 0x6ee   : > { %v2134_v30 = vpop.f32.mrf.mxu0  ;;  %2155 = vmatprep.mubr.msk.bf16.mxu1 %vm2377_vm1, %v2376_v1  ;;  %2152 = vmatpush3.bf16.msra.mxu1 %v2266_v41 }
 0x6ef   : > { %2153 = vmatprep.subr.bf16.mxu1 %v2376_v1 }
 0x6f0   : > { %v1379_v31 = vpop.f32.mrf.mxu0 }
 0x6f2   : > { %v2149_v32 = vpop.f32.mrf.mxu0  ;;  %2154 = vmatpush3.bf16.msra.mxu1 %v2267_v42 }
 0x6f3   : > { %2165 = vmatprep.subr.bf16.mxu1 %v2376_v1  ;;  %v2276_v32 = vld [vmem:[%s2867_s21 + $0x8] sm:$0xff]  }
 0x6f4   : > { %v1382_v33 = vpop.f32.mrf.mxu0 }
 0x6f5   : > { %v1444_v34 = vpack.c.bf16 %v1382_v33, %v1379_v31  ;;  %2156 = vmatmul.mubr.msk.bf16.vlgmr.msra.gmra.mxu1 %vm808_vm3, %v1265_v22  ;;  %v2275_v22 = vld [vmem:[%s2865_s19] sm:$0xff]  }
 0x6f6   : > { %v2150_v35 = vpop.f32.mrf.mxu0  ;;  %2167 = vmatprep.mubr.msk.bf16.mxu1 %vm2377_vm1, %v2376_v1  ;;  %v2277_v33 = vld [vmem:[%s2867_s21] sm:$0xff]  }
 0x6f7   : > { %v1449_v36 = vsel %vm808_vm3, %v1444_v34, 0  ;;  %v2003_v34 = vld [vmem:[%s2866_s20] ss:$0 sm:$0xff] }
 0x6f8   : > { %2160 = vmatpush3.bf16.xpose.msra.mxu0 %v1449_v36 }
 0x6f9   : > { %2171 = vmatprep.subr.bf16.mxu0 %v2376_v1 }
 0x7ad   : > { %v1320_v29 = vpop.f32.mrf.mxu1 }
 0x7ae   : > { %v1443_v37 = vpack.c.bf16 %v1320_v29, %v1320_v29 }
 0x7af   : > { %v2141_v38 = vpop.f32.mrf.mxu1 }
 0x7b0   : > { %2162 = vmatmul.mubr.msk.bf16.vlgmr.msra.gmra.mxu0 %vm808_vm3, %v1443_v37 }
 0x7b1   : > { %v1323_v39 = vpop.f32.mrf.mxu1  ;;  %2175 = vmatprep.mubr.msk.bf16.mxu0 %vm2377_vm1, %v2376_v1  ;;  %2172 = vmatpush3.bf16.msra.mxu0 %v2268_v63 }
 0x7b2   : > { %2173 = vmatprep.subr.bf16.mxu0 %v2376_v1 }
 0x7b3   : > { %v2142_v40 = vpop.f32.mrf.mxu1 }
 0x7b5   : > { %v1436_v51 = vpop.f32.mrf.mxu1  ;;  %2174 = vmatpush3.bf16.msra.mxu0 %v2269_v5 }
 0x7b6   : > { %2187 = vmatprep.subr.bf16.mxu0 %v2376_v1 }
 0x7b7   : > { %v2157_v52 = vpop.f32.mrf.mxu1 }
 0x7b9   : > { %v1439_v60 = vpop.f32.mrf.mxu1 }
 0x7ba   : > { %v1508_v62 = vpack.c.bf16 %v1439_v60, %v1436_v51 }
 0x7bb   : > { %v2158_v61 = vpop.f32.mrf.mxu1 }
 0x7bc   : > { %2166 = vmatpush3.bf16.msra.mxu1 %v1508_v62 }
 0x7bd   : > { %2179 = vmatprep.subr.bf16.mxu1 %v2376_v1 }
 0x870   : > { %v1485_v44 = vpop.f32.mrf.mxu0 }
 0x871   : > { %v1491_v45 = vmul.f32 0.17677669, %v1485_v44 }
 0x872   : > { %v2163_v46 = vpop.f32.mrf.mxu0 }
 0x873   : > { %v1494_v47 = vsel %vm1493_vm7, %v1491_v45, -1e+09 }
 0x874   : > { %v1488_v48 = vpop.f32.mrf.mxu0  ;;  %v1496_v49 = vsel %vm1495_vm8, %v1494_v47, -inf }
 0x875   : > { %1497 = vmax.xlane.f32.xlu1 %v1496_v49 }
 0x876   : > { %v2164_v50 = vpop.f32.mrf.mxu0 }
 0x8fe   : > { %v1498_v53 = vpop.xlane.xlu1 %1497 }
 0x8ff   : > { %v1499_v57 = vsub.f32 %v1494_v47, %v1498_v53 }
 0x901   : > { %v1500_v58 = vmul.f32 1.442695, %v1499_v57 }
 0x903   : > { %2282 = vpow2.f32 %v1500_v58 }
 0x910   : > { %v2283_v59 = vpop.eup %2282 }
 0x911   : > { %v1502_v55 = vsel %vm1495_vm8, %v2283_v59, 0.0 }
 0x912   : > { %1503 = vadd.xlane.f32.xlu1 %v1502_v55 }
 0x99b   : > { %v1504_v0 = vpop.xlane.xlu1 %1503 }
 0x99c   : > { %2284 = vrcp.f32 %v1504_v0 }
 0x9a9   : > { %v2285_v2 = vpop.eup %2284 }
 0x9aa   : > { %v1506_v3 = vmul.f32 %v2285_v2, %v2283_v59 }
 0x9ac   : > { %v1507_v4 = vpack.c.bf16 %v1506_v3, %v1506_v3  ;;  %1836 = vst.msk [vmem:[%s708_s3] sm:$0xff] %vm1495_vm8, %v1506_v3 }
 0x9ae   : > { %2168 = vmatmul.mubr.msk.bf16.vlgmr.msra.gmra.mxu1 %vm1495_vm8, %v1507_v4 }
 0x9af   : > { %2183 = vmatprep.mubr.msk.bf16.mxu1 %vm2377_vm1, %v2376_v1  ;;  %2180 = vmatpush3.bf16.msra.mxu1 %v2270_v6 }
 0x9b0   : > { %2181 = vmatprep.subr.bf16.mxu1 %v2376_v1 }
 0x9b3   : > { %2182 = vmatpush3.bf16.msra.mxu1 %v2271_v12 }
 0x9b4   : > { %2199 = vmatprep.subr.bf16.mxu1 %v2376_v1 }
 0xa6e   : > { %v1546_v7 = vpop.f32.mrf.mxu1 }
 0xa6f   : > { %v1552_v8 = vpack.c.bf16 %v1546_v7, %v1546_v7 }
 0xa70   : > { %v2169_v9 = vpop.f32.mrf.mxu1 }
 0xa71   : > { %2176 = vmatmul.mubr.msk.bf16.vlgmr.msra.gmra.mxu0 %vm808_vm3, %v1552_v8 }
 0xa72   : > { %v1549_v10 = vpop.f32.mrf.mxu1  ;;  %2195 = vmatprep.mubr.msk.bf16.mxu0 %vm2377_vm1, %v2376_v1  ;;  %2188 = vmatpush3.bf16.msra.mxu0 %v2272_v13 }
 0xa73   : > { %2189 = vmatprep.subr.bf16.mxu0 %v2376_v1 }
 0xa74   : > { %v2170_v11 = vpop.f32.mrf.mxu1 }
 0xa76   : > { %2190 = vmatpush3.bf16.msra.mxu0 %v2273_v14 }
 0xa77   : > { %2191 = vmatprep.subr.bf16.mxu0 %v2376_v1 }
 0xa7a   : > { %2192 = vmatpush3.bf16.msra.mxu0 %v2274_v21 }
 0xa7b   : > { %2193 = vmatprep.subr.bf16.mxu0 %v2376_v1 }
 0xa7e   : > { %2194 = vmatpush3.bf16.msra.mxu0 %v2275_v22 }
 0xb31   : > { %v1606_v15 = vpop.f32.mrf.mxu0 }
 0xb32   : > { %v1612_v16 = vadd.f32 %v1606_v15, %v2707_v25 }
 0xb33   : > { %v2177_v17 = vpop.f32.mrf.mxu0 }
 0xb34   : > { %v1613_v18 = vpack.c.bf16 %v1612_v16, %v1612_v16 }
 0xb35   : > { %v1609_v19 = vpop.f32.mrf.mxu0 }
 0xb36   : > { %2184 = vmatmul.mubr.msk.bf16.vlgmr.msra.gmra.mxu1 %vm808_vm3, %v1613_v18 }
 0xb37   : > { %v2178_v20 = vpop.f32.mrf.mxu0  ;;  %2203 = vmatprep.mubr.msk.bf16.mxu1 %vm2377_vm1, %v2376_v1  ;;  %2200 = vmatpush3.bf16.msra.mxu1 %v2276_v32 }
 0xb38   : > { %2201 = vmatprep.subr.bf16.mxu1 %v2376_v1 }
 0xb3b   : > { %2202 = vmatpush3.bf16.msra.mxu1 %v2277_v33 }
 0xbf6   : > { %v1674_v24 = vpop.f32.mrf.mxu1 }
 0xbf7   : > { %v1675_v25 = vadd.f32 %v1999_v23, %v1674_v24 }
 0xbf8   : > { %v2185_v26 = vpop.f32.mrf.mxu1 }
 0xbf9   : > { %v1680_v27 = vmax.f32 %v1675_v25, 0.0 }
 0xbfa   : > { %v1677_v28 = vpop.f32.mrf.mxu1 }
 0xbfb   : > { %v1681_v30 = vpack.c.bf16 %v1680_v27, %v1680_v27 }
 0xbfc   : > { %v2186_v31 = vpop.f32.mrf.mxu1 }
 0xbfd   : > { %2196 = vmatmul.mubr.msk.bf16.vlgmr.msra.gmra.mxu0 %vm1721_vm9, %v1681_v30 }
 0xcbd   : > { %v1759_v35 = vpop.f32.mrf.mxu0 }
 0xcbe   : > { %v1760_v36 = vadd.f32 %v2003_v34, %v1759_v35 }
 0xcbf   : > { %v2197_v29 = vpop.f32.mrf.mxu0 }
 0xcc0   : > { %v1765_v37 = vadd.f32 %v1760_v36, %v1612_v16 }
 0xcc1   : > { %v1762_v38 = vpop.f32.mrf.mxu0 }
 0xcc2   : > { %v1766_v39 = vpack.c.bf16 %v1765_v37, %v1765_v37 }
 0xcc3   : > { %v2198_v40 = vpop.f32.mrf.mxu0 }
 0xcc4   : > { %2204 = vmatmul.mubr.msk.bf16.vlgmr.msra.gmra.mxu1 %vm808_vm3, %v1766_v39 }
 0xcc5   : > { %2323 = shalt.err (!%p2320_p13)
}
 0xcc6   : > { %s2324_s9 = scalar_lea.hbm %s1856_s10, 128  ;;  %s2328_s29 = scalar_lea.hbm %s2870_s24, 256 }
 0xcc7   : > { %p2325_p0 = scmp.ne.s32.totalorder %s1856_s10, %s2324_s9  ;;  %p2329_p5 = scmp.lt.s32.totalorder %s1856_s10, %s2870_s24 }
 0xcc8   : > { %p2330_p6 = scmp.lt.s32.totalorder %s2328_s29, %s2324_s9 }
 0xcc9   : > { %p2326_p3 = pnand %p2325_p0, %p2548_p1 }
 0xcca   : > { %p2331_p7 = por %p2330_p6, %p2329_p5 }
 0xccb   : > { %p2327_p4 = pneg %p2326_p3 }
 0xccd   : > { %p2332_p8 = pnand %p2331_p7, %p2327_p4 }
 0xccf   : > { %2335 = shalt.err (!%p2332_p8)
}
 0xcd0   : > { %2207 = dma.vmem_to_hbm [thread:$0]  (%p2548_p1), %s1859_s0, 128, %s1856_s10, %s1842_s2   ;;  %v2009_v1 = vld [vmem:[%s2868_s22] ss:$0 sm:$0xff]  ;;  %vm1833_vm10 = vcmp.lt.s32.totalorder %v2657_v54, %v1139_v56 }
 0xcd1   : > { %s2919_s14 = sshll.u32 %s2567_s8, 3 }
 0xcd2   : > { %s721_s9 = scalar_lea.vmem %s2869_s23, %s2919_s14 }
 0xd84   : > { %v1827_v41 = vpop.f32.mrf.mxu1 }
 0xd85   : > { %v1828_v42 = vadd.f32 %v2009_v1, %v1827_v41 }
 0xd86   : > { %v2205_v43 = vpop.f32.mrf.mxu1 }
 0xd87   : > { %v1834_v44 = vsel %vm1833_vm10, %v1828_v42, 0.0 }
 0xd88   : > { %1835 = vst [vmem:[%s721_s9] sm:$0xff] %v1834_v44  ;;  %v1830_v45 = vpop.f32.mrf.mxu1 }
 0xd8a   : > { %v2206_v46 = vpop.f32.mrf.mxu1 }
 0xd8b PF: > { %p2213_p1 = scmp.ge.s32.totalorder %s2372_s18, 2  ;;  %s1877_s28 = sand.u32 1, %s2360_s1  }
 0xd8c   : > { %s1878_s8 = scalar_lea.sflag [#allocation6], %s1877_s28 }
 0xd8d   : > { %p2210_p9 = pnand %p2213_p1, %p2552_p2 }
 0xd8f   : > { %p2211_p10 = pneg %p2210_p9 }
 0xd91   : > { %2355 = dma.done.wait (%p2211_p10), %s1878_s8, 128  }
 0xd92   : > { %2357 = vsyncadd (%p2211_p10), %s1878_s8, 4294967168  ;;  %s2920_s18 = sld [smem:[#allocation10_spill]]  ;;  %s2923_s1 = smov %s2364_s4 }
 0xd93   : > { %s2921_s5 = sld [smem:[#allocation9_spill]] }
 0xd94   : > { %s2922_s25 = sld [smem:[#allocation11_spill]] }
 0xd98   : > { %p45_p11 = scmp.ge.s32.totalorder %s2920_s18, 4  }
 0xd99   : > { %s2924_s4 = smov %s2921_s5 }
 0xd9a   :  { %47 = sbr.rel (!%p45_p11) target bundleno = 50 (0x32), region = 154 }
 0xd9f   :  { %1883 = vsyncpa [#allocation6], 1 }
 0xda0   :  { %1885 = vsyncpa [#allocation6 + $0x1], 1 }

</bundles_post_ra>
